<compile_context>
chip_gen: v7x
topology: tpu7x:2x2x1
jax: 0.10.0
libtpu: 0.0.40
codegen_flags: <defaults>
</compile_context>

<pallas_src>
import functools

import jax
import jax.numpy as jnp
from jax.experimental import pallas as pl
from jax.experimental.pallas import tpu as pltpu

_EPS = 1e-8
_FUSED_MAX_F32_BYTES = 4 << 20   # fused single-pass path for slabs <= 4 MiB (f32-equiv)
_STREAM_BLOCK_BYTES = 2 << 20    # ~2 MiB streaming blocks (~90% of HBM roofline)
_VMEM_LIMIT_BYTES = 32 << 20     # explicit scoped-VMEM limit, safe on v5e/v6e/v7x
_MAX_WIDTH = 2048


def _pick_width(total):
    """Largest multiple of 128 (<= _MAX_WIDTH) that divides `total`, else None."""
    start = min(_MAX_WIDTH, (total // 128) * 128)
    for w in range(start, 127, -128):
        if total % w == 0:
            return w
    return None


def _sublane_pack(dtype):
    """Sublane packing factor per dtype (8 f32, 16 bf16, 32 int8/fp8)."""
    return {4: 8, 2: 16, 1: 32}.get(jnp.dtype(dtype).itemsize, 8)


def _fused_kernel(x_ref, o_ref, *, scale):
    """Single pass: whole slab resident in VMEM; 1 HBM read + 1 HBM write."""
    y = jnp.maximum(x_ref[...].astype(jnp.float32), 0.0)
    inv = scale / (jnp.sum(y) + _EPS)
    o_ref[...] = (y * inv).astype(o_ref.dtype)


def _sum_kernel(x_ref, acc_ref, *, tile_rows, valid_rows, inner, full_blocks,
                masked_tail):
    """Pass 1: accumulate relu(x) into this split's resident (8, W) f32 block."""
    i = pl.program_id(1)
    blk = pl.program_id(0) * inner + i

    @pl.when(i == 0)
    def _():
        acc_ref[...] = jnp.zeros_like(acc_ref)

    groups = tile_rows // 8
    width = acc_ref.shape[-1]

    def relu_f32():
        return jnp.maximum(x_ref[...].astype(jnp.float32), 0.0)

    def fold(y):
        # (tile_rows, W) -> (groups, 8, W) splits the sublane dim on (8,128) tile
        # boundaries (layout-free); the axis-0 reduce is pure full-vreg VALU adds.
        # The single cross-lane reduce happens once, in pass 2.
        acc_ref[...] += jnp.sum(y.reshape(groups, 8, width), axis=0)

    if not masked_tail:
        fold(relu_f32())
    else:
        @pl.when(blk < full_blocks)           # full in-range blocks: zero mask cost
        def _():
            fold(relu_f32())

        @pl.when(blk >= full_blocks)          # partial tail and/or grid-overhang block
        def _():
            y = relu_f32()
            row = jax.lax.broadcasted_iota(jnp.int32, y.shape, 0) + blk * tile_rows
            fold(jnp.where(row < valid_rows, y, 0.0))


def _norm_kernel(part_ref, x_ref, o_ref, *, scale):
    """Pass 2: out = relu(x) * scale / (global_sum + eps).

    The partials buffer is tiny (constant block index => DMA'd once); re-reducing it
    every step is free filler hidden under the big block DMA, so no carried scratch or
    extra dispatch is needed and the grid stays fully parallel (megacore-safe)."""
    inv = scale / (jnp.sum(part_ref[...]) + _EPS)
    y = jnp.maximum(x_ref[...].astype(jnp.float32), 0.0)
    o_ref[...] = (y * inv).astype(o_ref.dtype)


def lsn_pallas(x, scale=20000.0, *, block_bytes=_STREAM_BLOCK_BYTES,
               fused_max_bytes=_FUSED_MAX_F32_BYTES):
    """LSN forward. x: any shape (e.g. NCHW). Returns same shape/dtype."""
    orig_shape = x.shape
    orig_dtype = x.dtype
    total = int(x.size)
    if total == 0:
        return x
    itemsize = jnp.dtype(orig_dtype).itemsize
    pack = _sublane_pack(orig_dtype)
    scale = float(scale)
    width = _pick_width(total)   # free (bitcast) lane-dense reshape when it exists

    # ----------------- fused single-pass path (small inputs) -----------------
    if total * 4 <= fused_max_bytes:
        if width is not None:
            x2, padded = x.reshape(total // width, width), False
        else:
            # Rare ragged flat size: tiny pad keeps the slab fully (8,128)-tiled.
            pad = (-total) % 1024
            x2 = jnp.pad(x.reshape(-1), (0, pad)).reshape(-1, 128)
            padded = True
        out2 = pl.pallas_call(
            functools.partial(_fused_kernel, scale=scale),
            out_shape=jax.ShapeDtypeStruct(x2.shape, orig_dtype),
            compiler_params=pltpu.CompilerParams(
                vmem_limit_bytes=_VMEM_LIMIT_BYTES),
        )(x2)
        if padded:
            return out2.reshape(-1)[:total].reshape(orig_shape)
        return out2.reshape(orig_shape)

    # ----------------- streaming two-pass path (large inputs) -----------------
    padded = width is None
    if padded:
        # TODO(synk): large ragged flat sizes (total % 128 != 0) still pay one pad
        # copy; essentially never hit for NCHW activations.
        width = 1024
        pad = (-total) % width
        x2 = jnp.pad(x.reshape(-1), (0, pad)).reshape(-1, width)
    else:
        x2 = x.reshape(total // width, width)
    m_rows = x2.shape[0]

    # Block sizing: ~block_bytes per block; rows a multiple of the dtype's sublane
    # pack (8/16/32) so pass-2 writebacks stay unmasked full-tile stores.
    rows_target = max(pack, block_bytes // (width * itemsize))
    tile_rows = max(pack, (min(rows_target, m_rows) // pack) * pack)
    num_blocks = pl.cdiv(m_rows, tile_rows)
    last_partial = (m_rows % tile_rows) != 0
    full_blocks = num_blocks - 1 if last_partial else num_blocks

    # Always split the reduction 2 ways so both v7x TensorCores stream HBM; on
    # single-core chips the outer axis simply runs sequentially.  Odd block counts
    # leave one overhang step: its input index is clamped and it is fully masked.
    if num_blocks >= 2:
        splits, inner = 2, pl.cdiv(num_blocks, 2)
    else:
        splits, inner = 1, 1
    has_overhang = splits * inner != num_blocks

    # Pass 1: per-split (8, width) f32 partial sums of relu(x), resident in VMEM.
    partials = pl.pallas_call(
        functools.partial(_sum_kernel, tile_rows=tile_rows, valid_rows=m_rows,
                          inner=inner, full_blocks=full_blocks,
                          masked_tail=last_partial or has_overhang),
        grid=(splits, inner),
        in_specs=[pl.BlockSpec(
            (tile_rows, width),
            lambda s, i: (jnp.minimum(s * inner + i, num_blocks - 1), 0))],
        out_specs=pl.BlockSpec((8, width), lambda s, i: (s, 0)),
        out_shape=jax.ShapeDtypeStruct((splits * 8, width), jnp.float32),
        compiler_params=pltpu.CompilerParams(
            dimension_semantics=("parallel", "arbitrary"),
            vmem_limit_bytes=_VMEM_LIMIT_BYTES),
    )(x2)

    # Pass 2: elementwise normalization over large lane-dense blocks; the final
    # reduce + divide of the tiny partials buffer is folded into the kernel.
    out2 = pl.pallas_call(
        functools.partial(_norm_kernel, scale=scale),
        grid=(num_blocks,),
        in_specs=[
            pl.BlockSpec((splits * 8, width), lambda i: (0, 0)),   # tiny, fetched once
            pl.BlockSpec((tile_rows, width), lambda i: (i, 0)),
        ],
        out_specs=pl.BlockSpec((tile_rows, width), lambda i: (i, 0)),
        out_shape=jax.ShapeDtypeStruct((m_rows, width), orig_dtype),
        compiler_params=pltpu.CompilerParams(
            dimension_semantics=("parallel",),
            vmem_limit_bytes=_VMEM_LIMIT_BYTES),
    )(partials, x2)

    if padded:
        return out2.reshape(-1)[:total].reshape(orig_shape)
    return out2.reshape(orig_shape)


def lsn_ref(x, scale=20000.0):
    """Pure-JAX reference matching the PyTorch module."""
    y = jnp.maximum(x.astype(jnp.float32), 0.0)
    return (y * scale / (jnp.sum(y) + _EPS)).astype(x.dtype)


if __name__ == "__main__":
    key = jax.random.PRNGKey(0)
    k1, k2, k3, k4 = jax.random.split(key, 4)

    # 1) Typical small NCHW activation -> fused single-pass path (LSN has no params).
    x1 = jax.random.normal(k1, (2, 4, 16, 16), dtype=jnp.float32)
    out1 = jax.block_until_ready(lsn_pallas(x1, scale=20000.0))
    assert out1.shape == x1.shape and out1.dtype == x1.dtype
    assert jnp.allclose(out1, lsn_ref(x1), rtol=1e-5, atol=1e-5), "mismatch (fused)"

    # 2) Streaming path, even 2-way split, full blocks (forced with tiny blocks).
    x2 = jax.random.normal(k2, (4, 8, 32, 32), dtype=jnp.float32)
    out2 = jax.block_until_ready(
        lsn_pallas(x2, scale=20000.0, block_bytes=4096, fused_max_bytes=0))
    assert jnp.allclose(out2, lsn_ref(x2), rtol=1e-5, atol=1e-5), "mismatch (split)"

    # 3) Streaming path, partial last block (pl.when-gated tail mask).
    x3 = jax.random.normal(k3, (2, 9, 32, 32), dtype=jnp.float32)
    out3 = jax.block_until_ready(
        lsn_pallas(x3, scale=20000.0, block_bytes=4096, fused_max_bytes=0))
    assert jnp.allclose(out3, lsn_ref(x3), rtol=1e-5, atol=1e-5), "mismatch (mask)"

    # 4) Streaming path, odd block count -> clamped + fully-masked overhang step.
    x4 = jax.random.normal(k4, (2, 24, 32, 32), dtype=jnp.float32)
    out4 = jax.block_until_ready(
        lsn_pallas(x4, scale=20000.0, block_bytes=4096, fused_max_bytes=0))
    assert jnp.allclose(out4, lsn_ref(x4), rtol=1e-5, atol=1e-5), "mismatch (overhang)"

    print("KERNEL_OK")
</pallas_src>

<mosaic_0001>
module attributes {stable_mosaic.version = 11 : i64} {
  func.func @_fused_kernel(%arg0: memref<1x2048xf32, #tpu.memory_space<vmem>>, %arg1: memref<1x2048xf32, #tpu.memory_space<vmem>>) attributes {dimension_semantics = [], scalar_prefetch = 0 : i64, scratch_operands = 0 : i64, tpu.core_type = #tpu.core_type<tc>} {
    %c0 = arith.constant 0 : index
    %c0_0 = arith.constant 0 : index
    %0 = vector.load %arg0[%c0, %c0_0] : memref<1x2048xf32, #tpu.memory_space<vmem>>, vector<1x2048xf32>
    %cst = arith.constant 0.000000e+00 : f32
    %1 = vector.broadcast %cst : f32 to vector<1x2048xf32>
    %2 = arith.maximumf %0, %1 : vector<1x2048xf32>
    %3 = vector.shape_cast %2 : vector<1x2048xf32> to vector<1x1x2048xf32>
    %cst_1 = arith.constant dense<0.000000e+00> : vector<1xf32>
    %4 = vector.multi_reduction <add>, %3, %cst_1 [1, 2] : vector<1x1x2048xf32> to vector<1xf32>
    %5 = vector.shape_cast %4 : vector<1xf32> to vector<1x1x1xf32>
    %6 = vector.extract %5[0, 0, 0] : f32 from vector<1x1x1xf32>
    %cst_2 = arith.constant 9.99999993E-9 : f32
    %7 = arith.addf %6, %cst_2 : f32
    %cst_3 = arith.constant 2.000000e+04 : f32
    %8 = arith.divf %cst_3, %7 : f32
    %9 = vector.broadcast %8 : f32 to vector<1x2048xf32>
    %10 = arith.mulf %2, %9 : vector<1x2048xf32>
    %c0_4 = arith.constant 0 : index
    %c0_5 = arith.constant 0 : index
    %11 = vector.load %arg1[%c0_4, %c0_5] : memref<1x2048xf32, #tpu.memory_space<vmem>>, vector<1x2048xf32>
    tpu.vector_store %arg1[%c0_4, %c0_5], %10 {strides = array<i32>} : memref<1x2048xf32, #tpu.memory_space<vmem>>, vector<1x2048xf32>,
    return
  }
}

</mosaic_0001>

<bundles_post_ra>
// kernel: tpu_custom_call.1
= control target key start
LH: loop header
LB: loop body
LE: loop exit
PB: predicated region body
PF: predicated region fallthrough
CT: control target
= control target key end

     0   :  { %6 = vsyncpa [#allocation3], 0  ;;  %s292_s0 = inlined_call_operand.hbm [shape: f32[1,2048], index: 0, kind: input, shape index: {}]   ;;  %s293_s1 = inlined_call_operand.hbm [shape: f32[1,2048], index: 1, kind: output, shape index: {}]  }
   0x1   :  { %7 = vsyncpa [#allocation4], 0  ;;  %s229_s6 = smov [#allocation2]   ;;  %s181_s10 = scalar_lea.hbm %s292_s0, 256 }
   0x2   :  { %s14_s7 = sshll.u32 %s229_s6, 4  ;;  %p182_p0 = scmp.ne.s32.totalorder %s292_s0, %s181_s10  ;;  %s15_s7 = int_to_ptr.vmem [resolvable:$true] %s14_s7 }
   0x3   :  { %p185_p1 = scmp.lt.u32.totalorder %s181_s10, %s292_s0 }
   0x5   :  { %p187_p2 = pnand %p185_p1, %p182_p0 }
   0x7   :  { %190 = shalt.err (!%p187_p2)
}
   0x8   :  { %s191_s15 = scalar_lea.vmem %s15_s7, 256  ;;  %p196_p4 = scmp.lt.s32.totalorder %s15_s7, %s15_s7 }
   0x9   :  { %p192_p3 = scmp.ne.s32.totalorder %s15_s7, %s191_s15  ;;  %p197_p5 = scmp.lt.s32.totalorder %s191_s15, %s191_s15 }
   0xb   :  { %p198_p6 = por %p197_p5, %p196_p4 }
   0xd   :  { %p199_p7 = pnand %p198_p6, %p192_p3 }
   0xf   :  { %202 = shalt.err (!%p199_p7)
}
  0x10   :  { %17 = dma.hbm_to_vmem [thread:$0]  %s292_s0, 256, %s15_s7, [#allocation3]  }
  0x11   :  { %225 = dma.done.wait [#allocation3], 256  }
  0x12   :  { %226 = vsyncadd [#allocation3], 4294967040  ;;  %v27_v0 = vlaneseq  ;;  %v21_v5 = vld [vmem:[#allocation2] sm:$0xff]  ;;  %vm107_vm0 = vcmask 1040384   ;;  %v22_v19 = vld [vmem:[#allocation2 + $0x8] sm:$0xff]  ;;  %s230_s21 = smov [#allocation5]  }
  0x13   :  { %v253_v6 = vmax.f32 %v21_v5, 0.0  ;;  %v24_v25 = vmax.f32 %v22_v19, 0.0  ;;  %s164_s22 = sshll.u32 %s230_s21, 4  ;;  %s165_s22 = int_to_ptr.vmem [resolvable:$true] %s164_s22 }
  0x14   :  { %v28_v1 = vshrl.u32 %v27_v0, 7  ;;  %s203_s23 = scalar_lea.vmem %s165_s22, 256  ;;  %p208_p9 = scmp.lt.s32.totalorder %s165_s22, %s165_s22 }
  0x15   :  { %p204_p8 = scmp.ne.s32.totalorder %s165_s22, %s203_s23  ;;  %p209_p10 = scmp.lt.s32.totalorder %s203_s23, %s203_s23 }
  0x16   :  { %v29_v2 = vsub.s32 0, %v28_v1  ;;  %v33_v3 = vsub.s32 1, %v28_v1  ;;  %v37_v4 = vsub.s32 2, %v28_v1  ;;  %v41_v7 = vsub.s32 3, %v28_v1 }
  0x17   :  { %v45_v11 = vsub.s32 4, %v28_v1  ;;  %v49_v13 = vsub.s32 5, %v28_v1  ;;  %v53_v14 = vsub.s32 6, %v28_v1  ;;  %v57_v22 = vsub.s32 7, %v28_v1  ;;  %p210_p11 = por %p209_p10, %p208_p9 }
  0x18   :  { %v30_v8 = vrot.slane %v253_v6, %v29_v2  ;;  %v34_v9 = vrot.slane %v253_v6, %v33_v3  ;;  %v38_v10 = vrot.slane %v253_v6, %v37_v4  ;;  %v42_v12 = vrot.slane %v253_v6, %v41_v7 }
  0x19   :  { %v46_v15 = vrot.slane %v253_v6, %v45_v11  ;;  %v50_v21 = vrot.slane %v253_v6, %v49_v13  ;;  %v54_v26 = vrot.slane %v253_v6, %v53_v14  ;;  %v58_v29 = vrot.slane %v253_v6, %v57_v22  ;;  %p211_p12 = pnand %p210_p11, %p204_p8 }
  0x1a   :  { %v108_v16 = vsel %vm107_vm0, %v30_v8, 0.0  ;;  %v109_v17 = vsel %vm107_vm0, %v34_v9, 0.0  ;;  %v111_v18 = vsel %vm107_vm0, %v38_v10, 0.0  ;;  %v113_v23 = vsel %vm107_vm0, %v42_v12, 0.0 }
  0x1b   :  { %v110_v20 = vadd.f32 %v109_v17, %v108_v16  ;;  %v115_v27 = vsel %vm107_vm0, %v46_v15, 0.0  ;;  %v117_v30 = vsel %vm107_vm0, %v50_v21, 0.0  ;;  %v62_v32 = vrot.slane %v24_v25, %v29_v2 }
  0x1c   :  { %v119_v33 = vsel %vm107_vm0, %v54_v26, 0.0  ;;  %v66_v35 = vrot.slane %v24_v25, %v33_v3  ;;  %v121_v36 = vsel %vm107_vm0, %v58_v29, 0.0  ;;  %v70_v38 = vrot.slane %v24_v25, %v37_v4 }
  0x1d   :  { %v112_v24 = vadd.f32 %v111_v18, %v110_v20  ;;  %v123_v39 = vsel %vm107_vm0, %v62_v32, 0.0  ;;  %v74_v41 = vrot.slane %v24_v25, %v41_v7  ;;  %v78_v44 = vrot.slane %v24_v25, %v45_v11 }
  0x1e   :  { %v125_v42 = vsel %vm107_vm0, %v66_v35, 0.0  ;;  %v127_v45 = vsel %vm107_vm0, %v70_v38, 0.0  ;;  %v82_v47 = vrot.slane %v24_v25, %v49_v13  ;;  %v86_v50 = vrot.slane %v24_v25, %v53_v14 }
  0x1f   :  { %v114_v28 = vadd.f32 %v113_v23, %v112_v24  ;;  %v129_v48 = vsel %vm107_vm0, %v74_v41, 0.0  ;;  %v131_v51 = vsel %vm107_vm0, %v78_v44, 0.0  ;;  %v90_v53 = vrot.slane %v24_v25, %v57_v22 }
  0x20   :  { %v133_v54 = vsel %vm107_vm0, %v82_v47, 0.0  ;;  %v135_v56 = vsel %vm107_vm0, %v86_v50, 0.0 }
  0x21   :  { %v116_v31 = vadd.f32 %v115_v27, %v114_v28  ;;  %v137_v58 = vsel %vm107_vm0, %v90_v53, 0.0 }
  0x23   :  { %v118_v34 = vadd.f32 %v117_v30, %v116_v31 }
  0x25   :  { %v120_v37 = vadd.f32 %v119_v33, %v118_v34 }
  0x27   :  { %v122_v40 = vadd.f32 %v121_v36, %v120_v37 }
  0x29   :  { %v124_v43 = vadd.f32 %v123_v39, %v122_v40 }
  0x2b   :  { %v126_v46 = vadd.f32 %v125_v42, %v124_v43 }
  0x2d   :  { %v128_v49 = vadd.f32 %v127_v45, %v126_v46 }
  0x2f   :  { %v130_v52 = vadd.f32 %v129_v48, %v128_v49 }
  0x31   :  { %v132_v55 = vadd.f32 %v131_v51, %v130_v52 }
  0x33   :  { %v134_v57 = vadd.f32 %v133_v54, %v132_v55 }
  0x35   :  { %v136_v59 = vadd.f32 %v135_v56, %v134_v57 }
  0x37   :  { %v138_v60 = vadd.f32 %v137_v58, %v136_v59 }
  0x39   :  { %139 = vadd.xlane.f32.xlu0 %v138_v60 }
  0xc6   :  { %v140_v61 = vpop.xlane.xlu0 %139 }
  0xc7   :  { %v141_v62 = vrot.slane %v140_v61, 4 }
  0xc9   :  { %v142_v63 = vadd.f32 %v141_v62, %v140_v61 }
  0xcb   :  { %v143_v0 = vrot.slane %v142_v63, 2 }
  0xcd   :  { %v144_v1 = vadd.f32 %v143_v0, %v142_v63 }
  0xcf   :  { %v145_v2 = vrot.slane %v144_v1, 1 }
  0xd1   :  { %v146_v3 = vadd.f32 %v145_v2, %v144_v1 }
  0xd3   :  { %173 = vpush %v146_v3 }
 0x104   :  { %s174_s0 = spop %173 }
 0x105   :  { %s148_s18 = sadd.f32 1e-08, %s174_s0 }
 0x107   :  { %v149_v4 = vstv %s148_s18 }
 0x108   :  { %179 = vrcp.f32 %v149_v4 }
 0x112   :  { %v180_v5 = vpop.eup %179 }
 0x113   :  { %175 = vpush %v180_v5 }
 0x144   :  { %s176_s19 = spop %175 }
 0x145   :  { %s152_s20 = smul.f32 20000.0, %s176_s19 }
 0x147   :  { %v153_v7 = vstv %s152_s20 }
 0x148   :  { %v154_v8 = vmul.f32 %v153_v7, %v253_v6  ;;  %v155_v9 = vmul.f32 %v153_v7, %v24_v25 }
 0x14a   :  { %156 = vst [vmem:[#allocation5] sm:$0xff] %v154_v8  ;;  %157 = vst [vmem:[#allocation5 + $0x8] sm:$0xff] %v155_v9 }
 0x14b   :  { %214 = shalt.err (!%p211_p12)
}
 0x14c   :  { %s215_s26 = scalar_lea.hbm %s293_s1, 256 }
 0x14d   :  { %p216_p13 = scmp.ne.s32.totalorder %s293_s1, %s215_s26  ;;  %p219_p0 = scmp.lt.u32.totalorder %s215_s26, %s293_s1 }
 0x14f   :  { %p221_p1 = pnand %p219_p0, %p216_p13 }
 0x151   :  { %224 = shalt.err (!%p221_p1)
}
 0x152   :  { %167 = dma.vmem_to_hbm [thread:$0]  %s165_s22, 256, %s293_s1, [#allocation4]  }
 0x153   :  { %227 = dma.done.wait [#allocation4], 256  }
 0x154   :  { %228 = vsyncadd [#allocation4], 4294967040 }
 0x155   :  { %171 = vsyncpa [#allocation3], 1 }
 0x156   :  { %172 = vsyncpa [#allocation4], 1 }

</bundles_post_ra>
